<compile_context>
chip_gen: v7x
topology: tpu7x:2x2x1
jax: 0.10.0
libtpu: 0.0.40
codegen_flags: <defaults>
</compile_context>

<pallas_src>
import jax
import jax.numpy as jnp
from jax.experimental import pallas as pl
from jax.experimental.pallas import tpu as pltpu


def _ffn_kernel(x_ref, w1_ref, b1_ref, w2_ref, b2_ref, o_ref):
    # x_ref:  (tile_rows, d_in)
    # w1_ref: (d_in, d_hid)    b1_ref: (1, d_hid)
    # w2_ref: (d_hid, d_in)    b2_ref: (1, d_in)
    # o_ref:  (tile_rows, d_in)
    x = x_ref[...]
    h = jnp.dot(x, w1_ref[...], preferred_element_type=jnp.float32) + b1_ref[...]
    h = jnp.maximum(h, 0.0)  # ReLU
    # TODO(synk): training-mode dropout (stateful PRNG mask) not implemented;
    # eval-mode forward (dropout == identity) is what is computed here.
    out = jnp.dot(h, w2_ref[...], preferred_element_type=jnp.float32) + b2_ref[...]
    o_ref[...] = out.astype(o_ref.dtype)


def _pick_tile_rows(rows, max_tile_rows):
    """Pick a row-tile: as big as the budget allows, multiple of 8, and
    leaving >= 2 grid steps so the 'parallel' axis can shard across v7x's
    two TensorCores."""
    if rows <= 8:
        return rows                                  # single block == full dim
    tile = min(max_tile_rows, rows)
    tile = min(tile, -(-rows // 2))                  # keep at least 2 grid steps
    tile = -8 * (-tile // 8)                         # round up to sublane multiple
    return tile


def positionwise_feed_forward_4d(x, w1, b1, w2, b2, *, max_tile_rows=2048):
    """
    x:  (B, N, T, d_model)  float32
    w1: (d_model, d_ff)     b1: (d_ff,)
    w2: (d_ff, d_model)     b2: (d_model,)
    returns: (B, N, T, d_model)
    Weights are stored (in_features, out_features), i.e. already transposed
    relative to PyTorch's nn.Linear.weight.
    """
    B, N, T, d_model = x.shape
    d_ff = w1.shape[1]
    M = B * N * T
    x2 = x.reshape(M, d_model)

    # --- Lane-dense packing: fold `pack` consecutive rows into the 128-lane
    #     axis and use block-diagonal weights kron(I_pack, W). HBM bytes are
    #     unchanged; loads/stores/MXU pushes all become lane-dense.
    if d_model < 128 and 128 % d_model == 0 and M % (128 // d_model) == 0:
        pack = 128 // d_model
    else:
        pack = 1                                       # natural-layout fallback

    if pack > 1:
        rows = M // pack
        x_in = x2.reshape(rows, pack * d_model)        # free row-major reshape
        eye = jnp.eye(pack, dtype=w1.dtype)
        w1_k = jnp.kron(eye, w1)                       # (pack*d_model, pack*d_ff)
        w2_k = jnp.kron(eye, w2)                       # (pack*d_ff, pack*d_model)
        b1_k = jnp.tile(b1, pack).reshape(1, pack * d_ff)
        b2_k = jnp.tile(b2, pack).reshape(1, pack * d_model)
    else:
        rows = M
        x_in = x2
        w1_k, w2_k = w1, w2
        b1_k = b1.reshape(1, d_ff)
        b2_k = b2.reshape(1, d_model)

    d_in = pack * d_model
    d_hid = pack * d_ff

    tile_rows = _pick_tile_rows(rows, max_tile_rows)
    n_tiles = pl.cdiv(rows, tile_rows)                 # uneven last block is masked

    cost = pl.CostEstimate(
        flops=4 * M * d_model * d_ff,                  # two matmuls (logical)
        transcendentals=0,
        bytes_accessed=(2 * M * d_model + 2 * d_model * d_ff + d_model + d_ff) * 4,
    )

    out2 = pl.pallas_call(
        _ffn_kernel,
        out_shape=jax.ShapeDtypeStruct((rows, d_in), jnp.float32),
        grid_spec=pltpu.PrefetchScalarGridSpec(
            num_scalar_prefetch=0,
            grid=(n_tiles,),
            in_specs=[
                pl.BlockSpec((tile_rows, d_in), lambda i: (i, 0)),   # x tile
                pl.BlockSpec((d_in, d_hid), lambda i: (0, 0)),       # W1 (resident)
                pl.BlockSpec((1, d_hid), lambda i: (0, 0)),          # b1 (resident)
                pl.BlockSpec((d_hid, d_in), lambda i: (0, 0)),       # W2 (resident)
                pl.BlockSpec((1, d_in), lambda i: (0, 0)),           # b2 (resident)
            ],
            out_specs=pl.BlockSpec((tile_rows, d_in), lambda i: (i, 0)),
        ),
        compiler_params=pltpu.CompilerParams(
            dimension_semantics=("parallel",),
            # v5e defaults to 16 MiB scoped VMEM; 32 MiB is safe on all gens.
            vmem_limit_bytes=32 * 1024 * 1024,
        ),
        cost_estimate=cost,
    )(x_in, w1_k, b1_k, w2_k, b2_k)

    # Row-major reshape back; no slicing needed (out shape is exactly (rows, d_in)).
    return out2.reshape(B, N, T, d_model)


def _reference(x, w1, b1, w2, b2):
    """Pure-JAX reference mirroring the PyTorch forward (eval mode)."""
    h = jax.nn.relu(jnp.einsum('bntd,df->bntf', x, w1) + b1)
    return jnp.einsum('bntf,fd->bntd', h, w2) + b2


if __name__ == "__main__":
    # (batch, num_nodes, num_timesteps, d_model), d_ff hidden width.
    B, N, T, d_model, d_ff = 2, 32, 16, 32, 64

    key = jax.random.PRNGKey(0)
    kx, kw1, kb1, kw2, kb2 = jax.random.split(key, 5)

    x = jax.random.normal(kx, (B, N, T, d_model), dtype=jnp.float32)
    # nn.Linear-style init, stored as (in, out)
    w1 = (1.0 / jnp.sqrt(d_model)) * jax.random.normal(
        kw1, (d_model, d_ff), dtype=jnp.float32)
    b1 = (1.0 / jnp.sqrt(d_model)) * jax.random.normal(
        kb1, (d_ff,), dtype=jnp.float32)
    w2 = (1.0 / jnp.sqrt(d_ff)) * jax.random.normal(
        kw2, (d_ff, d_model), dtype=jnp.float32)
    b2 = (1.0 / jnp.sqrt(d_ff)) * jax.random.normal(
        kb2, (d_model,), dtype=jnp.float32)

    # Main case: packed lane-dense path, 2 grid tiles.
    out = positionwise_feed_forward_4d(x, w1, b1, w2, b2)
    out = jax.block_until_ready(out)
    ref = _reference(x, w1, b1, w2, b2)
    assert out.shape == (B, N, T, d_model)
    assert jnp.allclose(out, ref, atol=2e-5, rtol=2e-5)

    # Extra coverage: uneven last block (masked) in both packed and plain paths.
    for shp in [(1, 20, 3), (2, 5, 9)]:
        xb = jax.random.normal(jax.random.PRNGKey(1), shp + (d_model,),
                               dtype=jnp.float32)
        ob = positionwise_feed_forward_4d(xb, w1, b1, w2, b2)
        ob = jax.block_until_ready(ob)
        rb = _reference(xb, w1, b1, w2, b2)
        assert ob.shape == rb.shape
        assert jnp.allclose(ob, rb, atol=2e-5, rtol=2e-5)

    print("KERNEL_OK")
</pallas_src>

<mosaic_0001>
module attributes {stable_mosaic.version = 11 : i64} {
  func.func @_ffn_kernel(%arg0: i32, %arg1: memref<128x128xf32, #tpu.memory_space<vmem>>, %arg2: memref<128x256xf32, #tpu.memory_space<vmem>>, %arg3: memref<1x256xf32, #tpu.memory_space<vmem>>, %arg4: memref<256x128xf32, #tpu.memory_space<vmem>>, %arg5: memref<1x128xf32, #tpu.memory_space<vmem>>, %arg6: memref<128x128xf32, #tpu.memory_space<vmem>>) attributes {dimension_semantics = [#tpu.dimension_semantics<parallel>], iteration_bounds = array<i64: 2>, scalar_prefetch = 0 : i64, scratch_operands = 0 : i64, tpu.core_type = #tpu.core_type<tc>, window_params = [{transform_indices = @transform_0, window_bounds = array<i64: 128, 128>}, {pipeline_mode = #tpu.pipeline_mode<synchronous>, transform_indices = @transform_1, window_bounds = array<i64: 128, 256>}, {pipeline_mode = #tpu.pipeline_mode<synchronous>, transform_indices = @transform_2, window_bounds = array<i64: 1, 256>}, {pipeline_mode = #tpu.pipeline_mode<synchronous>, transform_indices = @transform_3, window_bounds = array<i64: 256, 128>}, {pipeline_mode = #tpu.pipeline_mode<synchronous>, transform_indices = @transform_4, window_bounds = array<i64: 1, 128>}, {transform_indices = @transform_5, window_bounds = array<i64: 128, 128>}]} {
    %c0 = arith.constant 0 : index
    %c0_0 = arith.constant 0 : index
    %0 = vector.load %arg1[%c0, %c0_0] : memref<128x128xf32, #tpu.memory_space<vmem>>, vector<128x128xf32>
    %c0_1 = arith.constant 0 : index
    %c0_2 = arith.constant 0 : index
    %1 = vector.load %arg2[%c0_1, %c0_2] : memref<128x256xf32, #tpu.memory_space<vmem>>, vector<128x256xf32>
    %cst = arith.constant dense<0.000000e+00> : vector<128x256xf32>
    %2 = tpu.matmul %0, %1, %cst {dimension_numbers = #tpu.dot_dimension_numbers<[1], [0], [0], [1], [0, 0, 1, 1], [], []>} : vector<128x128xf32>, vector<128x256xf32>, vector<128x256xf32> -> vector<128x256xf32>
    %c0_3 = arith.constant 0 : index
    %c0_4 = arith.constant 0 : index
    %3 = vector.load %arg3[%c0_3, %c0_4] : memref<1x256xf32, #tpu.memory_space<vmem>>, vector<1x256xf32>
    %4 = vector.broadcast %3 : vector<1x256xf32> to vector<128x256xf32>
    %5 = arith.addf %2, %4 : vector<128x256xf32>
    %cst_5 = arith.constant 0.000000e+00 : f32
    %6 = vector.broadcast %cst_5 : f32 to vector<128x256xf32>
    %7 = arith.maximumf %5, %6 : vector<128x256xf32>
    %c0_6 = arith.constant 0 : index
    %c0_7 = arith.constant 0 : index
    %8 = vector.load %arg4[%c0_6, %c0_7] : memref<256x128xf32, #tpu.memory_space<vmem>>, vector<256x128xf32>
    %cst_8 = arith.constant dense<0.000000e+00> : vector<128x128xf32>
    %9 = tpu.matmul %7, %8, %cst_8 {dimension_numbers = #tpu.dot_dimension_numbers<[1], [0], [0], [1], [0, 0, 1, 1], [], []>} : vector<128x256xf32>, vector<256x128xf32>, vector<128x128xf32> -> vector<128x128xf32>
    %c0_9 = arith.constant 0 : index
    %c0_10 = arith.constant 0 : index
    %10 = vector.load %arg5[%c0_9, %c0_10] : memref<1x128xf32, #tpu.memory_space<vmem>>, vector<1x128xf32>
    %11 = vector.broadcast %10 : vector<1x128xf32> to vector<128x128xf32>
    %12 = arith.addf %9, %11 : vector<128x128xf32>
    %c0_11 = arith.constant 0 : index
    %c0_12 = arith.constant 0 : index
    %13 = vector.load %arg6[%c0_11, %c0_12] : memref<128x128xf32, #tpu.memory_space<vmem>>, vector<128x128xf32>
    tpu.vector_store %arg6[%c0_11, %c0_12], %12 {strides = array<i32>} : memref<128x128xf32, #tpu.memory_space<vmem>>, vector<128x128xf32>,
    return
  }
  func.func @transform_0(%arg0: i32) -> (i32, i32) {
    %c0_i32 = arith.constant 0 : i32
    %c0_i32_0 = arith.constant 0 : i32
    return %arg0, %c0_i32 : i32, i32
  }
  func.func @transform_1(%arg0: i32) -> (i32, i32) {
    %c0_i32 = arith.constant 0 : i32
    %c0_i32_0 = arith.constant 0 : i32
    %c0_i32_1 = arith.constant 0 : i32
    return %c0_i32, %c0_i32_0 : i32, i32
  }
  func.func @transform_2(%arg0: i32) -> (i32, i32) {
    %c0_i32 = arith.constant 0 : i32
    %c0_i32_0 = arith.constant 0 : i32
    %c0_i32_1 = arith.constant 0 : i32
    return %c0_i32, %c0_i32_0 : i32, i32
  }
  func.func @transform_3(%arg0: i32) -> (i32, i32) {
    %c0_i32 = arith.constant 0 : i32
    %c0_i32_0 = arith.constant 0 : i32
    %c0_i32_1 = arith.constant 0 : i32
    return %c0_i32, %c0_i32_0 : i32, i32
  }
  func.func @transform_4(%arg0: i32) -> (i32, i32) {
    %c0_i32 = arith.constant 0 : i32
    %c0_i32_0 = arith.constant 0 : i32
    %c0_i32_1 = arith.constant 0 : i32
    return %c0_i32, %c0_i32_0 : i32, i32
  }
  func.func @transform_5(%arg0: i32) -> (i32, i32) {
    %c0_i32 = arith.constant 0 : i32
    %c0_i32_0 = arith.constant 0 : i32
    return %arg0, %c0_i32 : i32, i32
  }
}

</mosaic_0001>

<bundles_post_ra>
// kernel: tpu_custom_call.1
= control target key start
LH: loop header
LB: loop body
LE: loop exit
PB: predicated region body
PF: predicated region fallthrough
CT: control target
= control target key end

     0   :  { %10 = vsyncpa [#allocation3], 0  ;;  %s1628_s0 = inlined_call_operand.hbm [shape: f32[256,128], index: 0, kind: input, shape index: {}]   ;;  %s1629_s1 = inlined_call_operand.hbm [shape: f32[128,256], index: 1, kind: input, shape index: {}]   ;;  %s1630_s2 = inlined_call_operand.vmem [shape: f32[1,256], index: 2, kind: input, shape index: {}]   ;;  %s1631_s3 = inlined_call_operand.hbm [shape: f32[256,128], index: 3, kind: input, shape index: {}]   ;;  %s1632_s4 = inlined_call_operand.vmem [shape: f32[1,128], index: 4, kind: input, shape index: {}]   ;;  %s1633_s5 = inlined_call_operand.hbm [shape: f32[256,128], index: 5, kind: output, shape index: {}]  }
   0x1   :  { %12 = vsyncpa [#allocation3 + $0x1], 0 }
   0x2   :  { %13 = vsyncpa [#allocation6], 0 }
   0x3   :  { %14 = vsyncpa [#allocation4], 0 }
   0x4   :  { %16 = vsyncpa [#allocation4 + $0x1], 0  ;;  %s1271_s18 = smov 0   ;;  %s1273_s19 = smov 0  }
   0x5   :  { %s1275_s20 = smov 0   ;;  %s1277_s21 = smov 0  }
   0x6 LB: > { %s1292_s22 = sadd.s32 4294967295, %s1228_s21   ;;  %s833_s23 = sadd.s32 4294967294, %s1228_s21   ;;  %s1228_s21 = sphi %s1277_s21, %s1653_s21   ;;  %s1224_s20 = sphi %s1275_s20, %s1652_s20   ;;  %s1220_s19 = sphi %s1273_s19, %s1651_s19   ;;  %s1216_s18 = sphi %s1271_s18, %s1650_s18  }
   0x7   : > { %p42_p0 = scmp.ne.s32.totalorder %s1220_s19, %s1216_s18  ;;  %p1634_p1 = scmp.eq.s32.totalorder %s1292_s22, 0 }
   0x8   : > { %p156_p3 = scmp.eq.s32.totalorder %s833_s23, 1  ;;  %p834_p5 = scmp.ge.s32.totalorder %s1228_s21, 1 }
   0x9   : > { %p1301_p4 = por %p1634_p1, %p42_p0  ;;  %p163_p7 = scmp.lt.s32.totalorder %s1228_s21, 3 }
   0xa   : > { %p1306_p6 = por %p156_p3, %p42_p0  ;;  %s1230_s27 = smov [#allocation5]  }
   0xb   : > { %s1637_s24 = scalar_select %p1301_p4, 1, 0 }
   0xc   : > { %s1638_s25 = scalar_select %p1306_p6, 1, 0 }
   0xd   : > { %p1311_p8 = pnand %p834_p5, %p163_p7  ;;  %s175_s28 = sshll.u32 %s1230_s27, 4  ;;  %s1315_s28 = int_to_ptr.vmem [resolvable:$true] %s175_s28 }
   0xe   : > { %s1231_s30 = smov [#allocation7]   ;;  %s1072_s9 = scalar_lea.hbm %s1629_s1, 4096 }
   0xf   : > { %p1010_p9 = pneg %p1311_p8  ;;  %s191_s6 = sshll.u32 %s1231_s30, 4  ;;  %s1326_s6 = int_to_ptr.vmem [resolvable:$true] %s191_s6 }
  0x10   : > { %p1073_p12 = scmp.ne.s32.totalorder %s1629_s1, %s1072_s9  ;;  %p1079_p5 = scmp.lt.u32.totalorder %s1072_s9, %s1629_s1 }
  0x11   : > { %p1322_p11 = pnand %p1010_p9, %p1634_p1 }
  0x13   : > { %p1074_p13 = pneg %p1322_p11 }
  0x15   : > { %p1075_p0 = pnand %p1074_p13, %p1073_p12 }
  0x17   : > { %p1076_p3 = pneg %p1075_p0 }
  0x19   : > { %p1081_p7 = pnand %p1079_p5, %p1076_p3 }
  0x1b   : > { %1084 = shalt.err (!%p1081_p7)
}
  0x1c   : > { %s1085_s14 = scalar_lea.vmem %s1315_s28, 4096  ;;  %p1093_p2 = scmp.lt.s32.totalorder %s1315_s28, %s1315_s28 }
  0x1d   : > { %p1086_p9 = scmp.ne.s32.totalorder %s1315_s28, %s1085_s14  ;;  %p1094_p12 = scmp.lt.s32.totalorder %s1085_s14, %s1085_s14 }
  0x1f   : > { %p1088_p10 = pnand %p1086_p9, %p1074_p13  ;;  %p1095_p0 = por %p1094_p12, %p1093_p2 }
  0x21   : > { %p1089_p1 = pneg %p1088_p10 }
  0x23   : > { %p1096_p6 = pnand %p1095_p0, %p1089_p1 }
  0x25   : > { %1099 = shalt.err (!%p1096_p6)
}
  0x26   : > { %s1232_s15 = smov 256   ;;  %s1233_s16 = smov 16  }
  0x27   : > { %1013 = dma.hbm_to_vmem [thread:$0]  (!%p1322_p11), %s1629_s1, 4096, %s1315_s28, [#allocation6], %s1232_s15, %s1232_s15, %s1233_s16  }
  0x28   : > { %s1100_s7 = scalar_lea.hbm %s1631_s3, 4096 }
  0x29   : > { %p1101_p2 = scmp.ne.s32.totalorder %s1631_s3, %s1100_s7  ;;  %p1107_p10 = scmp.lt.u32.totalorder %s1100_s7, %s1631_s3 }
  0x2b   : > { %p1103_p1 = pnand %p1101_p2, %p1074_p13 }
  0x2d   : > { %p1104_p6 = pneg %p1103_p1 }
  0x2f   : > { %p1109_p3 = pnand %p1107_p10, %p1104_p6 }
  0x31   : > { %1112 = shalt.err (!%p1109_p3)
}
  0x32   : > { %s1113_s28 = scalar_lea.vmem %s1326_s6, 4096  ;;  %p1121_p12 = scmp.lt.s32.totalorder %s1326_s6, %s1326_s6 }
  0x33   : > { %p1114_p5 = scmp.ne.s32.totalorder %s1326_s6, %s1113_s28  ;;  %p1122_p0 = scmp.lt.s32.totalorder %s1113_s28, %s1113_s28 }
  0x35   : > { %p1116_p7 = pnand %p1114_p5, %p1074_p13  ;;  %p1123_p2 = por %p1122_p0, %p1121_p12 }
  0x37   : > { %p1117_p9 = pneg %p1116_p7 }
  0x39   : > { %p1124_p1 = pnand %p1123_p2, %p1117_p9 }
  0x3b   : > { %1127 = shalt.err (!%p1124_p1)
}
  0x3c   : > { %s1234_s12 = smov 128   ;;  %s1235_s13 = smov 8  }
  0x3d   : > { %1016 = dma.hbm_to_vmem [thread:$0]  (!%p1322_p11), %s1631_s3, 4096, %s1326_s6, [#allocation6], %s1234_s12, %s1234_s12, %s1235_s13  }
  0x3e   : > { %s1384_s16 = sadd.s32 1, %s1228_s21   ;;  %s29_s23 = sadd.s32 1, %s1224_s20 }
  0x3f   : > { %s26_s17 = ssub.s32 %s1228_s21, %s1384_s16  ;;  %p36_p6 = scmp.ne.s32.totalorder %s1224_s20, %s1220_s19 }
  0x40   : > { %p27_p13 = scmp.eq.s32.totalorder %s26_s17, 0  ;;  %p37_p10 = scmp.eq.s32.totalorder %s1228_s21, 0 }
  0x41   : > { %p1641_p5 = scmp.eq.s32.totalorder %s1292_s22, 1  ;;  %p1027_p9 = scmp.lt.s32.totalorder %s1228_s21, 2 }
  0x42   : > { %s1393_s27 = scalar_select %p27_p13, %s1224_s20, %s29_s23  }
  0x43   : > { %p38_p3 = por %p37_p10, %p36_p6  ;;  %p1397_p7 = por %p1641_p5, %p36_p6 }
  0x44   : > { %s208_s30 = sand.u32 1, %s1224_s20   ;;  %s852_s6 = sshll.u32 %s1228_s21, 11 }
  0x45   : > { %s1642_s29 = scalar_select %p1397_p7, 1, 0 }
  0x46   : > { %s838_s7 = sshll.u32 %s208_s30, 7  ;;  %s1407_s10 = scalar_lea.hbm %s1628_s0, %s852_s6 }
  0x47   : > { %s212_s11 = scalar_lea.vmem [#allocation2], %s838_s7  ;;  %p1411_p11 = pnand %p1027_p9, %p38_p3 }
  0x48   : > { %s219_s28 = sshll.u32 %s212_s11, 4  ;;  %s1415_s15 = scalar_lea.sflag [#allocation3], %s208_s30  ;;  %s1409_s28 = int_to_ptr.vmem [resolvable:$true] %s219_s28 }
  0x49   : > { %s1128_s17 = scalar_lea.hbm %s1407_s10, 2048  ;;  %p1130_p0 = pneg %p1411_p11 }
  0x4a   : > { %p1129_p12 = scmp.ne.s32.totalorder %s1407_s10, %s1128_s17  ;;  %s1133_s6 = scalar_lea.hbm %s1628_s0, 4096 }
  0x4b   : > { %p1134_p13 = scmp.lt.u32.totalorder %s1407_s10, %s1628_s0  ;;  %p1135_p6 = scmp.lt.u32.totalorder %s1133_s6, %s1128_s17 }
  0x4c   : > { %p1131_p2 = pnand %p1130_p0, %p1129_p12  ;;  %p1137_p3 = scmp.lt.u32.totalorder %s1128_s17, %s1407_s10 }
  0x4d   : > { %p1136_p10 = por %p1135_p6, %p1134_p13 }
  0x4e   : > { %p1132_p1 = pneg %p1131_p2 }
  0x4f   : > { %p1138_p5 = por %p1137_p3, %p1136_p10 }
  0x51   : > { %p1139_p9 = pnand %p1138_p5, %p1132_p1 }
  0x53   : > { %1142 = shalt.err (!%p1139_p9)
}
  0x54   : > { %s1143_s30 = scalar_lea.vmem %s1409_s28, 2048  ;;  %s1236_s11 = smov [#allocation2]  }
  0x55   : > { %p1144_p12 = scmp.ne.s32.totalorder %s1409_s28, %s1143_s30  ;;  %s1148_s23 = sshll.u32 %s1236_s11, 4  ;;  %s1149_s23 = int_to_ptr.vmem [resolvable:$false] %s1148_s23 }
  0x56   : > { %s1150_s7 = scalar_lea.vmem %s1149_s23, 4096  ;;  %p1151_p4 = scmp.lt.s32.totalorder %s1409_s28, %s1149_s23 }
  0x57   : > { %p1146_p2 = pnand %p1144_p12, %p1130_p0  ;;  %p1152_p13 = scmp.lt.s32.totalorder %s1150_s7, %s1143_s30 }
  0x59   : > { %p1147_p7 = pneg %p1146_p2  ;;  %p1153_p6 = por %p1152_p13, %p1151_p4 }
  0x5b   : > { %p1154_p10 = pnand %p1153_p6, %p1147_p7 }
  0x5d   : > { %1157 = shalt.err (!%p1154_p10)
}
  0x5e   : > { %1020 = dma.hbm_to_vmem [thread:$0]  (!%p1411_p11), %s1407_s10, 2048, %s1409_s28, %s1415_s15, %s1234_s12, %s1234_s12, %s1235_s13  }
  0x5f   : > { %231 = sbr.rel (%p1311_p8) target bundleno = 651 (0x28b), region = 40  ;;  %s1449_s17 = sand.u32 (!%p1311_p8), 1, %s1220_s19  }
  0x60   : > { %s842_s6 = sshll.u32 (!%p1311_p8), %s1449_s17, 7  ;;  %s234_s8 = scalar_lea.sflag (!%p1311_p8), [#allocation3], %s1449_s17 }
  0x61   : > { %s1455_s14 = scalar_lea.vmem (!%p1311_p8), [#allocation2], %s842_s6  ;;  %p1644_p4 = scmp.ne.s32.totalorder (!%p1311_p8), %s1637_s24, 0 }
  0x66   : > { %1203 = dma.done.wait (%p1644_p4), %s234_s8, 2048  }
  0x67   : > { %1205 = vsyncadd (%p1644_p4), %s234_s8, 4294965248  ;;  %p1645_p7 = scmp.eq.s32.totalorder %s1292_s22, 0 }
  0x69   : > { %1207 = dma.done.wait (%p1645_p7), [#allocation6], 8192   ;;  %p1646_p8 = pmov %p1645_p7 }
  0x6a   : > { %v1237_v0 = vmov 0.0   ;;  %v291_v1 = vld [vmem:[#allocation5 + $0x8] sm:$0xff]  ;;  %v293_v2 = vld [vmem:[#allocation5 + $0x18] sm:$0xff]  ;;  %v290_v3 = vld [vmem:[#allocation5] sm:$0xff]  ;;  %s1544_s10 = scalar_lea.vmem [#allocation8], %s842_s6  ;;  %s853_s28 = sshll.u32 %s1292_s22, 11 }
  0x6b   : > { %1209 = vsyncadd (%p1646_p8), [#allocation6], 4294959104  ;;  %398 = vmatprep.mubr.f32.mxu0 %v1237_v0  ;;  %v934_v4 = vpack.c.bf16 %v293_v2, %v291_v1  ;;  %v292_v5 = vld [vmem:[#allocation5 + $0x10] sm:$0xff]  ;;  %v295_v6 = vld [vmem:[#allocation5 + $0x28] sm:$0xff]  ;;  %s741_s15 = sshll.u32 %s1544_s10, 4  ;;  %s1580_s11 = scalar_lea.hbm %s1633_s5, %s853_s28  ;;  %s1582_s15 = int_to_ptr.vmem [resolvable:$true] %s741_s15 }
  0x6c   : > { %v297_v7 = vld [vmem:[#allocation5 + $0x38] sm:$0xff]  ;;  %v936_v8 = vpack.c.bf16 %v292_v5, %v290_v3  ;;  %v294_v10 = vld [vmem:[#allocation5 + $0x20] sm:$0xff]  ;;  %v296_v11 = vld [vmem:[#allocation5 + $0x30] sm:$0xff]  ;;  %s728_s23 = scalar_lea.sflag [#allocation4], %s1449_s17  ;;  %s1158_s7 = scalar_lea.vmem %s1582_s15, 2048 }
  0x6d   : > { %v938_v9 = vpack.c.bf16 %v297_v7, %v295_v6  ;;  %v299_v12 = vld [vmem:[#allocation5 + $0x48] sm:$0xff]  ;;  %935 = vmatprep.subr.bf16.mxu0 %v934_v4  ;;  %v301_v13 = vld [vmem:[#allocation5 + $0x58] sm:$0xff]  ;;  %v940_v14 = vpack.c.bf16 %v296_v11, %v294_v10  ;;  %v298_v16 = vld [vmem:[#allocation5 + $0x40] sm:$0xff]  ;;  %p1159_p11 = scmp.ne.s32.totalorder %s1582_s15, %s1158_s7  ;;  %p1647_p0 = scmp.ne.s32.totalorder %s1642_s29, 0 }
  0x6e   : > { %937 = vmatpush1.bf16.msra.mxu0 %v936_v8  ;;  %v942_v15 = vpack.c.bf16 %v301_v13, %v299_v12  ;;  %v300_v17 = vld [vmem:[#allocation5 + $0x50] sm:$0xff]  ;;  %v303_v18 = vld [vmem:[#allocation5 + $0x68] sm:$0xff]  ;;  %v305_v19 = vld [vmem:[#allocation5 + $0x78] sm:$0xff]  ;;  %s1238_s22 = smov [#allocation8]  }
  0x6f   : > { %939 = vmatprep.subr.bf16.mxu0 %v938_v9  ;;  %v944_v20 = vpack.c.bf16 %v300_v17, %v298_v16  ;;  %v946_v21 = vpack.c.bf16 %v305_v19, %v303_v18  ;;  %v302_v22 = vld [vmem:[#allocation5 + $0x60] sm:$0xff]  ;;  %v304_v23 = vld [vmem:[#allocation5 + $0x70] sm:$0xff]  ;;  %v307_v24 = vld [vmem:[#allocation5 + $0x88] sm:$0xff]  ;;  %p1160_p1 = pnand %p1159_p11, %p1647_p0  ;;  %s1162_s6 = sshll.u32 %s1238_s22, 4  ;;  %s1163_s6 = int_to_ptr.vmem [resolvable:$false] %s1162_s6 }
  0x70   : > { %v309_v25 = vld [vmem:[#allocation5 + $0x98] sm:$0xff]  ;;  %v948_v26 = vpack.c.bf16 %v304_v23, %v302_v22  ;;  %v306_v28 = vld [vmem:[#allocation5 + $0x80] sm:$0xff]  ;;  %v308_v29 = vld [vmem:[#allocation5 + $0x90] sm:$0xff]  ;;  %s1164_s8 = scalar_lea.vmem %s1163_s6, 4096  ;;  %p1165_p5 = scmp.lt.s32.totalorder %s1582_s15, %s1163_s6 }
  0x71   : > { %v950_v27 = vpack.c.bf16 %v309_v25, %v307_v24  ;;  %v311_v30 = vld [vmem:[#allocation5 + $0xa8] sm:$0xff]  ;;  %v313_v31 = vld [vmem:[#allocation5 + $0xb8] sm:$0xff]  ;;  %v310_v32 = vld [vmem:[#allocation5 + $0xa0] sm:$0xff]  ;;  %v952_v34 = vpack.c.bf16 %v308_v29, %v306_v28  ;;  %p1161_p3 = pneg %p1160_p1  ;;  %p1166_p9 = scmp.lt.s32.totalorder %s1164_s8, %s1158_s7 }
  0x72   : > { %941 = vmatpush1.bf16.msra.mxu0 %v940_v14  ;;  %v312_v33 = vld [vmem:[#allocation5 + $0xb0] sm:$0xff]  ;;  %v315_v35 = vld [vmem:[#allocation5 + $0xc8] sm:$0xff]  ;;  %v317_v36 = vld [vmem:[#allocation5 + $0xd8] sm:$0xff]  ;;  %v954_v40 = vpack.c.bf16 %v313_v31, %v311_v30 }
  0x73   : > { %943 = vmatprep.subr.bf16.mxu0 %v942_v15  ;;  %v543_v37 = vld [vmem:[#allocation7 + $0x80] sm:$0xff]  ;;  %v544_v38 = vld [vmem:[#allocation7 + $0x88] sm:$0xff]  ;;  %v545_v43 = vld [vmem:[#allocation7 + $0x90] sm:$0xff]  ;;  %v956_v51 = vpack.c.bf16 %v312_v33, %v310_v32  ;;  %v958_v55 = vpack.c.bf16 %v317_v36, %v315_v35  ;;  %p1167_p12 = por %p1166_p9, %p1165_p5 }
  0x74   : > { %v527_v39 = vld [vmem:[#allocation7] sm:$0xff]  ;;  %v966_v41 = vpack.c.bf16 %v544_v38, %v543_v37  ;;  %v528_v42 = vld [vmem:[#allocation7 + $0x8] sm:$0xff]  ;;  %v546_v44 = vld [vmem:[#allocation7 + $0x98] sm:$0xff] }
  0x75   : > { %v968_v45 = vpack.c.bf16 %v528_v42, %v527_v39  ;;  %v970_v46 = vpack.c.bf16 %v546_v44, %v545_v43  ;;  %v529_v47 = vld [vmem:[#allocation7 + $0x10] sm:$0xff]  ;;  %v530_v48 = vld [vmem:[#allocation7 + $0x18] sm:$0xff]  ;;  %v547_v49 = vld [vmem:[#allocation7 + $0xa0] sm:$0xff]  ;;  %p1168_p2 = pnand %p1167_p12, %p1161_p3 }
  0x76   : > { %945 = vmatpush1.bf16.msra.mxu0 %v944_v20  ;;  %967 = vmatprep.subr.bf16.mxu1 %v966_v41  ;;  %v548_v50 = vld [vmem:[#allocation7 + $0xa8] sm:$0xff]  ;;  %v314_v52 = vld [vmem:[#allocation5 + $0xc0] sm:$0xff]  ;;  %v316_v53 = vld [vmem:[#allocation5 + $0xd0] sm:$0xff]  ;;  %v972_v54 = vpack.c.bf16 %v530_v48, %v529_v47 }
  0x77   : > { %947 = vmatprep.subr.bf16.mxu0 %v946_v21  ;;  %969 = vmatpush3.bf16.msra.mxu1 %v968_v45  ;;  %v319_v56 = vld [vmem:[#allocation5 + $0xe8] sm:$0xff]  ;;  %v974_v57 = vpack.c.bf16 %v548_v50, %v547_v49  ;;  %v531_v58 = vld [vmem:[#allocation7 + $0x20] sm:$0xff]  ;;  %v321_v60 = vld [vmem:[#allocation5 + $0xf8] sm:$0xff]  ;;  %v960_v63 = vpack.c.bf16 %v316_v53, %v314_v52  ;;  %v324_v50 = vlaneseq }
  0x78   : > { %971 = vmatprep.subr.bf16.mxu1 %v970_v46  ;;  %v532_v59 = vld [vmem:[#allocation7 + $0x28] sm:$0xff]  ;;  %v549_v61 = vld [vmem:[#allocation7 + $0xb0] sm:$0xff]  ;;  %v550_v62 = vld [vmem:[#allocation7 + $0xb8] sm:$0xff]  ;;  %v962_v3 = vpack.c.bf16 %v321_v60, %v319_v56 }
  0x79   : > { %v318_v1 = vld [vmem:[#allocation5 + $0xe0] sm:$0xff]  ;;  %v976_v2 = vpack.c.bf16 %v532_v59, %v531_v58  ;;  %v320_v4 = vld [vmem:[#allocation5 + $0xf0] sm:$0xff]  ;;  %v978_v5 = vpack.c.bf16 %v550_v62, %v549_v61  ;;  %v534_v7 = vld [vmem:[#allocation7 + $0x38] sm:$0xff] }
  0x7a   : > { %949 = vmatpush1.bf16.msra.mxu0 %v948_v26  ;;  %v533_v6 = vld [vmem:[#allocation7 + $0x30] sm:$0xff]  ;;  %v551_v8 = vld [vmem:[#allocation7 + $0xc0] sm:$0xff]  ;;  %v552_v9 = vld [vmem:[#allocation7 + $0xc8] sm:$0xff]  ;;  %v964_v10 = vpack.c.bf16 %v320_v4, %v318_v1 }
  0x7b   : > { %951 = vmatprep.subr.bf16.mxu0 %v950_v27  ;;  %973 = vmatpush3.bf16.msra.mxu1 %v972_v54  ;;  %v980_v11 = vpack.c.bf16 %v534_v7, %v533_v6  ;;  %v982_v12 = vpack.c.bf16 %v552_v9, %v551_v8  ;;  %v535_v13 = vld [vmem:[#allocation7 + $0x40] sm:$0xff]  ;;  %v536_v14 = vld [vmem:[#allocation7 + $0x48] sm:$0xff]  ;;  %v553_v15 = vld [vmem:[#allocation7 + $0xd0] sm:$0xff] }
  0x7c   : > { %975 = vmatprep.subr.bf16.mxu1 %v974_v57  ;;  %v554_v16 = vld [vmem:[#allocation7 + $0xd8] sm:$0xff]  ;;  %v274_v17 = vld [vmem:[%s1455_s14] sm:$0xff]  ;;  %v984_v18 = vpack.c.bf16 %v536_v14, %v535_v13  ;;  %v537_v20 = vld [vmem:[#allocation7 + $0x50] sm:$0xff] }
  0x7d   : > { %v986_v19 = vpack.c.bf16 %v554_v16, %v553_v15  ;;  %v538_v21 = vld [vmem:[#allocation7 + $0x58] sm:$0xff]  ;;  %v555_v22 = vld [vmem:[#allocation7 + $0xe0] sm:$0xff]  ;;  %v556_v23 = vld [vmem:[#allocation7 + $0xe8] sm:$0xff] }
  0x7e   : > { %953 = vmatpush1.bf16.msra.mxu0 %v952_v34  ;;  %v275_v24 = vld [vmem:[%s1455_s14 + $0x8] sm:$0xff]  ;;  %v988_v25 = vpack.c.bf16 %v538_v21, %v537_v20  ;;  %v990_v26 = vpack.c.bf16 %v556_v23, %v555_v22  ;;  %v276_v27 = vld [vmem:[%s1455_s14 + $0x10] sm:$0xff]  ;;  %v277_v28 = vld [vmem:[%s1455_s14 + $0x18] sm:$0xff] }
  0x7f   : > { %955 = vmatprep.subr.bf16.mxu0 %v954_v40  ;;  %977 = vmatpush3.bf16.msra.mxu1 %v976_v2  ;;  %v278_v29 = vld [vmem:[%s1455_s14 + $0x20] sm:$0xff]  ;;  %v279_v30 = vld [vmem:[%s1455_s14 + $0x28] sm:$0xff]  ;;  %v280_v31 = vld [vmem:[%s1455_s14 + $0x30] sm:$0xff] }
  0x80   : > { %979 = vmatprep.subr.bf16.mxu1 %v978_v5  ;;  %v281_v32 = vld [vmem:[%s1455_s14 + $0x38] sm:$0xff]  ;;  %v282_v33 = vld [vmem:[%s1455_s14 + $0x40] sm:$0xff]  ;;  %v283_v34 = vld [vmem:[%s1455_s14 + $0x48] sm:$0xff] }
  0x81   : > { %v284_v35 = vld [vmem:[%s1455_s14 + $0x50] sm:$0xff]  ;;  %v285_v36 = vld [vmem:[%s1455_s14 + $0x58] sm:$0xff]  ;;  %v286_v37 = vld [vmem:[%s1455_s14 + $0x60] sm:$0xff] }
  0x82   : > { %957 = vmatpush1.bf16.msra.mxu0 %v956_v51  ;;  %v287_v38 = vld [vmem:[%s1455_s14 + $0x68] sm:$0xff]  ;;  %v288_v39 = vld [vmem:[%s1455_s14 + $0x70] sm:$0xff]  ;;  %v289_v40 = vld [vmem:[%s1455_s14 + $0x78] sm:$0xff]  ;;  %v325_v51 = vshrl.u32 %v324_v50, 7 }
  0x83   : > { %959 = vmatprep.subr.bf16.mxu0 %v958_v55  ;;  %981 = vmatpush3.bf16.msra.mxu1 %v980_v11  ;;  %v539_v41 = vld [vmem:[#allocation7 + $0x60] sm:$0xff]  ;;  %v540_v42 = vld [vmem:[#allocation7 + $0x68] sm:$0xff]  ;;  %v557_v44 = vld [vmem:[#allocation7 + $0xf0] sm:$0xff] }
  0x84   : > { %983 = vmatprep.subr.bf16.mxu1 %v982_v12  ;;  %v992_v43 = vpack.c.bf16 %v540_v42, %v539_v41  ;;  %v558_v45 = vld [vmem:[#allocation7 + $0xf8] sm:$0xff]  ;;  %v541_v47 = vld [vmem:[#allocation7 + $0x70] sm:$0xff]  ;;  %v326_v52 = vsub.s32 0, %v325_v51  ;;  %v330_v53 = vsub.s32 1, %v325_v51 }
  0x85   : > { %v994_v46 = vpack.c.bf16 %v558_v45, %v557_v44  ;;  %v542_v48 = vld [vmem:[#allocation7 + $0x78] sm:$0xff] }
  0x86   : > { %961 = vmatpush1.bf16.msra.mxu0 %v960_v63  ;;  %v996_v49 = vpack.c.bf16 %v542_v48, %v541_v47 }
  0x87   : > { %963 = vmatprep.subr.bf16.mxu0 %v962_v3  ;;  %985 = vmatpush3.bf16.msra.mxu1 %v984_v18 }
  0x88   : > { %987 = vmatprep.subr.bf16.mxu1 %v986_v19 }
  0x8a   : > { %965 = vmatpush1.bf16.msra.mxu0 %v964_v10 }
  0x8b   : > { %989 = vmatpush3.bf16.msra.mxu1 %v988_v25 }
  0x8c   : > { %991 = vmatprep.subr.bf16.mxu1 %v990_v26 }
  0x8d   : > { %399 = vmatmul.mubr.f32.vlgmr.msra.gmra.mrb[0].mxu0 %v274_v17 }
  0x8e   : > { %404 = vmatprep.mubr.f32.mxu0 %v1237_v0 }
  0x8f   : > { %993 = vmatpush3.bf16.msra.mxu1 %v992_v43 }
  0x90   : > { %995 = vmatprep.subr.bf16.mxu1 %v994_v46 }
  0x91   : > { %405 = vmatmul.mubr.f32.gmra.mrb[2].mxu0 %v275_v24 }
  0x92   : > { %410 = vmatprep.mubr.f32.mxu0 %v1237_v0 }
  0x93   : > { %997 = vmatpush3.bf16.msra.mxu1 %v996_v49 }
  0x95   : > { %411 = vmatmul.mubr.f32.gmra.mrb[4].mxu0 %v276_v27 }
  0x96   : > { %416 = vmatprep.mubr.f32.mxu0 %v1237_v0 }
  0x99   : > { %417 = vmatmul.mubr.f32.gmra.mrb[6].mxu0 %v277_v28 }
  0x9a   : > { %422 = vmatprep.mubr.f32.mxu0 %v1237_v0 }
  0x9d   : > { %423 = vmatmul.mubr.f32.gmra.mrb[8].mxu0 %v278_v29 }
  0x9e   : > { %428 = vmatprep.mubr.f32.mxu0 %v1237_v0 }
  0xa1   : > { %429 = vmatmul.mubr.f32.gmra.mrb[10].mxu0 %v279_v30 }
  0xa2   : > { %434 = vmatprep.mubr.f32.mxu0 %v1237_v0 }
  0xa5   : > { %435 = vmatmul.mubr.f32.gmra.mrb[12].mxu0 %v280_v31 }
  0xa6   : > { %440 = vmatprep.mubr.f32.mxu0 %v1237_v0 }
  0xa9   : > { %441 = vmatmul.mubr.f32.gmra.mrb[14].mxu0 %v281_v32 }
  0xaa   : > { %446 = vmatprep.mubr.f32.mxu0 %v1237_v0 }
  0xad   : > { %447 = vmatmul.mubr.f32.gmra.mrb[16].mxu0 %v282_v33 }
  0xae   : > { %452 = vmatprep.mubr.f32.mxu0 %v1237_v0 }
  0xb1   : > { %453 = vmatmul.mubr.f32.gmra.mrb[18].mxu0 %v283_v34 }
  0xb2   : > { %458 = vmatprep.mubr.f32.mxu0 %v1237_v0 }
  0xb5   : > { %459 = vmatmul.mubr.f32.gmra.mrb[20].mxu0 %v284_v35 }
  0xb6   : > { %464 = vmatprep.mubr.f32.mxu0 %v1237_v0 }
  0xb9   : > { %465 = vmatmul.mubr.f32.gmra.mrb[22].mxu0 %v285_v36 }
  0xba   : > { %470 = vmatprep.mubr.f32.mxu0 %v1237_v0 }
  0xbd   : > { %471 = vmatmul.mubr.f32.gmra.mrb[24].mxu0 %v286_v37 }
  0xbe   : > { %476 = vmatprep.mubr.f32.mxu0 %v1237_v0 }
  0xc1   : > { %477 = vmatmul.mubr.f32.gmra.mrb[26].mxu0 %v287_v38 }
  0xc2   : > { %482 = vmatprep.mubr.f32.mxu0 %v1237_v0 }
  0xc5   : > { %483 = vmatmul.mubr.f32.gmra.mrb[28].mxu0 %v288_v39 }
  0xc6   : > { %488 = vmatprep.mubr.f32.mxu0 %v1237_v0  ;;  %v322_v0 = vld [vmem:[%s1630_s2] sm:$0x3] }
  0xc7   : > { %v1500_v54 = vrot.slane %v322_v0, %v326_v52  ;;  %v1502_v55 = vrot.slane %v322_v0, %v330_v53 }
  0xc9   : > { %489 = vmatmul.mubr.f32.gmra.mrb[30].mxu0 %v289_v40 }
 0x160   : > { %v400_v56 = vpop.f32.mrb[0].mxu0 }
 0x161   : > { %v401_v57 = vadd.f32 %v400_v56, %v1500_v54  ;;  %v402_v58 = vpop.f32.mrb[1].mxu0 }
 0x162   : > { %v403_v59 = vadd.f32 %v402_v58, %v1502_v55 }
 0x163   : > { %v495_v62 = vmax.f32 %v401_v57, 0.0 }
 0x164   : > { %v406_v60 = vpop.f32.mrb[2].mxu0  ;;  %v496_v61 = vmax.f32 %v403_v59, 0.0 }
 0x165   : > { %v407_v63 = vadd.f32 %v406_v60, %v1500_v54  ;;  %v408_v1 = vpop.f32.mrb[3].mxu0 }
 0x166   : > { %v409_v2 = vadd.f32 %v408_v1, %v1502_v55  ;;  %630 = vmatprep.mubr.f32.mxu1 %v496_v61 }
 0x167   : > { %631 = vmatmul.mubr.f32.vlgmr.msra.gmra.mrb[0].mxu1 %v495_v62  ;;  %v497_v5 = vmax.f32 %v407_v63, 0.0 }
 0x168   : > { %v498_v3 = vmax.f32 %v409_v2, 0.0  ;;  %v412_v4 = vpop.f32.mrb[4].mxu0 }
 0x169   : > { %v413_v6 = vadd.f32 %v412_v4, %v1500_v54  ;;  %v414_v7 = vpop.f32.mrb[5].mxu0 }
 0x16a   : > { %v415_v8 = vadd.f32 %v414_v7, %v1502_v55  ;;  %635 = vmatprep.mubr.f32.mxu1 %v498_v3 }
 0x16b   : > { %636 = vmatmul.mubr.f32.gmra.mrb[2].mxu1 %v497_v5  ;;  %v499_v11 = vmax.f32 %v413_v6, 0.0 }
 0x16c   : > { %v500_v9 = vmax.f32 %v415_v8, 0.0  ;;  %v418_v10 = vpop.f32.mrb[6].mxu0 }
 0x16d   : > { %v419_v12 = vadd.f32 %v418_v10, %v1500_v54  ;;  %v420_v13 = vpop.f32.mrb[7].mxu0 }
 0x16e   : > { %v421_v14 = vadd.f32 %v420_v13, %v1502_v55  ;;  %640 = vmatprep.mubr.f32.mxu1 %v500_v9 }
 0x16f   : > { %641 = vmatmul.mubr.f32.gmra.mrb[4].mxu1 %v499_v11  ;;  %v501_v17 = vmax.f32 %v419_v12, 0.0 }
 0x170   : > { %v502_v15 = vmax.f32 %v421_v14, 0.0  ;;  %v424_v16 = vpop.f32.mrb[8].mxu0 }
 0x171   : > { %v425_v18 = vadd.f32 %v424_v16, %v1500_v54  ;;  %v426_v19 = vpop.f32.mrb[9].mxu0 }
 0x172   : > { %v427_v20 = vadd.f32 %v426_v19, %v1502_v55  ;;  %645 = vmatprep.mubr.f32.mxu1 %v502_v15 }
 0x173   : > { %646 = vmatmul.mubr.f32.gmra.mrb[6].mxu1 %v501_v17  ;;  %v503_v23 = vmax.f32 %v425_v18, 0.0 }
 0x174   : > { %v504_v21 = vmax.f32 %v427_v20, 0.0  ;;  %v430_v22 = vpop.f32.mrb[10].mxu0 }
 0x175   : > { %v431_v24 = vadd.f32 %v430_v22, %v1500_v54  ;;  %v432_v25 = vpop.f32.mrb[11].mxu0 }
 0x176   : > { %v433_v26 = vadd.f32 %v432_v25, %v1502_v55  ;;  %650 = vmatprep.mubr.f32.mxu1 %v504_v21 }
 0x177   : > { %651 = vmatmul.mubr.f32.gmra.mrb[8].mxu1 %v503_v23  ;;  %v505_v29 = vmax.f32 %v431_v24, 0.0 }
 0x178   : > { %v506_v27 = vmax.f32 %v433_v26, 0.0  ;;  %v436_v28 = vpop.f32.mrb[12].mxu0 }
 0x179   : > { %v437_v30 = vadd.f32 %v436_v28, %v1500_v54  ;;  %v438_v31 = vpop.f32.mrb[13].mxu0  ;;  %v1539_v28 = vld [vmem:[%s1632_s4] ss:$0 sm:$0xff] }
 0x17a   : > { %v439_v32 = vadd.f32 %v438_v31, %v1502_v55  ;;  %655 = vmatprep.mubr.f32.mxu1 %v506_v27 }
 0x17b   : > { %656 = vmatmul.mubr.f32.gmra.mrb[10].mxu1 %v505_v29  ;;  %v507_v35 = vmax.f32 %v437_v30, 0.0 }
 0x17c   : > { %v508_v33 = vmax.f32 %v439_v32, 0.0  ;;  %v442_v34 = vpop.f32.mrb[14].mxu0 }
 0x17d   : > { %v443_v36 = vadd.f32 %v442_v34, %v1500_v54  ;;  %v444_v37 = vpop.f32.mrb[15].mxu0 }
 0x17e   : > { %v445_v38 = vadd.f32 %v444_v37, %v1502_v55  ;;  %660 = vmatprep.mubr.f32.mxu1 %v508_v33 }
 0x17f   : > { %661 = vmatmul.mubr.f32.gmra.mrb[12].mxu1 %v507_v35  ;;  %v509_v41 = vmax.f32 %v443_v36, 0.0 }
 0x180   : > { %v510_v39 = vmax.f32 %v445_v38, 0.0  ;;  %v448_v40 = vpop.f32.mrb[16].mxu0 }
 0x181   : > { %v449_v42 = vadd.f32 %v448_v40, %v1500_v54  ;;  %v450_v43 = vpop.f32.mrb[17].mxu0 }
 0x182   : > { %v451_v44 = vadd.f32 %v450_v43, %v1502_v55  ;;  %665 = vmatprep.mubr.f32.mxu1 %v510_v39 }
 0x183   : > { %666 = vmatmul.mubr.f32.gmra.mrb[14].mxu1 %v509_v41  ;;  %v511_v47 = vmax.f32 %v449_v42, 0.0 }
 0x184   : > { %v512_v45 = vmax.f32 %v451_v44, 0.0  ;;  %v454_v46 = vpop.f32.mrb[18].mxu0 }
 0x185   : > { %v455_v48 = vadd.f32 %v454_v46, %v1500_v54  ;;  %v456_v49 = vpop.f32.mrb[19].mxu0 }
 0x186   : > { %v457_v50 = vadd.f32 %v456_v49, %v1502_v55  ;;  %670 = vmatprep.mubr.f32.mxu1 %v512_v45 }
 0x187   : > { %671 = vmatmul.mubr.f32.gmra.mrb[16].mxu1 %v511_v47  ;;  %v513_v0 = vmax.f32 %v455_v48, 0.0 }
 0x188   : > { %v514_v51 = vmax.f32 %v457_v50, 0.0  ;;  %v460_v52 = vpop.f32.mrb[20].mxu0 }
 0x189   : > { %v461_v53 = vadd.f32 %v460_v52, %v1500_v54  ;;  %v462_v56 = vpop.f32.mrb[21].mxu0 }
 0x18a   : > { %v463_v57 = vadd.f32 %v462_v56, %v1502_v55  ;;  %675 = vmatprep.mubr.f32.mxu1 %v514_v51 }
 0x18b   : > { %676 = vmatmul.mubr.f32.gmra.mrb[18].mxu1 %v513_v0  ;;  %v515_v60 = vmax.f32 %v461_v53, 0.0 }
 0x18c   : > { %v516_v58 = vmax.f32 %v463_v57, 0.0  ;;  %v466_v59 = vpop.f32.mrb[22].mxu0 }
 0x18d   : > { %v467_v61 = vadd.f32 %v466_v59, %v1500_v54  ;;  %v468_v62 = vpop.f32.mrb[23].mxu0 }
 0x18e   : > { %v469_v63 = vadd.f32 %v468_v62, %v1502_v55  ;;  %680 = vmatprep.mubr.f32.mxu1 %v516_v58 }
 0x18f   : > { %681 = vmatmul.mubr.f32.gmra.mrb[20].mxu1 %v515_v60  ;;  %v517_v3 = vmax.f32 %v467_v61, 0.0 }
 0x190   : > { %v518_v1 = vmax.f32 %v469_v63, 0.0  ;;  %v472_v2 = vpop.f32.mrb[24].mxu0 }
 0x191   : > { %v473_v4 = vadd.f32 %v472_v2, %v1500_v54  ;;  %v474_v5 = vpop.f32.mrb[25].mxu0 }
 0x192   : > { %v475_v6 = vadd.f32 %v474_v5, %v1502_v55  ;;  %685 = vmatprep.mubr.f32.mxu1 %v518_v1 }
 0x193   : > { %686 = vmatmul.mubr.f32.gmra.mrb[22].mxu1 %v517_v3  ;;  %v519_v9 = vmax.f32 %v473_v4, 0.0 }
 0x194   : > { %v520_v7 = vmax.f32 %v475_v6, 0.0  ;;  %v478_v8 = vpop.f32.mrb[26].mxu0 }
 0x195   : > { %v479_v10 = vadd.f32 %v478_v8, %v1500_v54  ;;  %v480_v11 = vpop.f32.mrb[27].mxu0 }
 0x196   : > { %v481_v12 = vadd.f32 %v480_v11, %v1502_v55  ;;  %690 = vmatprep.mubr.f32.mxu1 %v520_v7 }
 0x197   : > { %691 = vmatmul.mubr.f32.gmra.mrb[24].mxu1 %v519_v9  ;;  %v521_v15 = vmax.f32 %v479_v10, 0.0 }
 0x198   : > { %v522_v13 = vmax.f32 %v481_v12, 0.0  ;;  %v484_v14 = vpop.f32.mrb[28].mxu0 }
 0x199   : > { %v485_v16 = vadd.f32 %v484_v14, %v1500_v54  ;;  %v486_v17 = vpop.f32.mrb[29].mxu0 }
 0x19a   : > { %v487_v18 = vadd.f32 %v486_v17, %v1502_v55  ;;  %695 = vmatprep.mubr.f32.mxu1 %v522_v13 }
 0x19b   : > { %696 = vmatmul.mubr.f32.gmra.mrb[26].mxu1 %v521_v15  ;;  %v523_v21 = vmax.f32 %v485_v16, 0.0 }
 0x19c   : > { %v524_v19 = vmax.f32 %v487_v18, 0.0  ;;  %v490_v20 = vpop.f32.mrb[30].mxu0 }
 0x19d   : > { %v491_v22 = vadd.f32 %v490_v20, %v1500_v54  ;;  %v492_v23 = vpop.f32.mrb[31].mxu0 }
 0x19e   : > { %v493_v24 = vadd.f32 %v492_v23, %v1502_v55  ;;  %700 = vmatprep.mubr.f32.mxu1 %v524_v19 }
 0x19f   : > { %701 = vmatmul.mubr.f32.gmra.mrb[28].mxu1 %v523_v21  ;;  %v525_v26 = vmax.f32 %v491_v22, 0.0 }
 0x1a0   : > { %v526_v25 = vmax.f32 %v493_v24, 0.0 }
 0x1a2   : > { %705 = vmatprep.mubr.f32.mxu1 %v526_v25 }
 0x1a3   : > { %706 = vmatmul.mubr.f32.gmra.mrb[30].mxu1 %v525_v26 }
 0x23a   : > { %v886_v27 = vpop.f32.mrb[0].mxu1 }
 0x23b   : > { %v887_v29 = vpop.f32.mrb[1].mxu1 }
 0x23c   : > { %v888_v30 = vadd.f32 %v887_v29, %v886_v27 }
 0x23e   : > { %v633_v54 = vadd.f32 %v888_v30, %v1539_v28  ;;  %v889_v31 = vpop.f32.mrb[2].mxu1 }
 0x23f   : > { %v890_v32 = vpop.f32.mrb[3].mxu1 }
 0x240   : > { %711 = vst [vmem:[%s1544_s10] sm:$0xff] %v633_v54  ;;  %v891_v55 = vadd.f32 %v890_v32, %v889_v31 }
 0x242   : > { %v638_v33 = vadd.f32 %v891_v55, %v1539_v28  ;;  %v892_v34 = vpop.f32.mrb[4].mxu1 }
 0x243   : > { %v893_v35 = vpop.f32.mrb[5].mxu1 }
 0x244   : > { %712 = vst [vmem:[%s1544_s10 + $0x8] sm:$0xff] %v638_v33  ;;  %v894_v36 = vadd.f32 %v893_v35, %v892_v34 }
 0x246   : > { %v643_v37 = vadd.f32 %v894_v36, %v1539_v28  ;;  %v895_v38 = vpop.f32.mrb[6].mxu1 }
 0x247   : > { %v896_v39 = vpop.f32.mrb[7].mxu1 }
 0x248   : > { %713 = vst [vmem:[%s1544_s10 + $0x10] sm:$0xff] %v643_v37  ;;  %v897_v40 = vadd.f32 %v896_v39, %v895_v38 }
 0x24a   : > { %v648_v41 = vadd.f32 %v897_v40, %v1539_v28  ;;  %v898_v42 = vpop.f32.mrb[8].mxu1 }
 0x24b   : > { %v899_v43 = vpop.f32.mrb[9].mxu1 }
 0x24c   : > { %714 = vst [vmem:[%s1544_s10 + $0x18] sm:$0xff] %v648_v41  ;;  %v900_v44 = vadd.f32 %v899_v43, %v898_v42 }
 0x24e   : > { %v653_v45 = vadd.f32 %v900_v44, %v1539_v28  ;;  %v901_v46 = vpop.f32.mrb[10].mxu1 }
 0x24f   : > { %v902_v47 = vpop.f32.mrb[11].mxu1 }
 0x250   : > { %715 = vst [vmem:[%s1544_s10 + $0x20] sm:$0xff] %v653_v45  ;;  %v903_v48 = vadd.f32 %v902_v47, %v901_v46 }
 0x252   : > { %v658_v49 = vadd.f32 %v903_v48, %v1539_v28  ;;  %v904_v50 = vpop.f32.mrb[12].mxu1 }
 0x253   : > { %v905_v51 = vpop.f32.mrb[13].mxu1 }
 0x254   : > { %716 = vst [vmem:[%s1544_s10 + $0x28] sm:$0xff] %v658_v49  ;;  %v906_v52 = vadd.f32 %v905_v51, %v904_v50 }
 0x256   : > { %v663_v0 = vadd.f32 %v906_v52, %v1539_v28  ;;  %v907_v53 = vpop.f32.mrb[14].mxu1 }
 0x257   : > { %v908_v56 = vpop.f32.mrb[15].mxu1 }
 0x258   : > { %717 = vst [vmem:[%s1544_s10 + $0x30] sm:$0xff] %v663_v0  ;;  %v909_v57 = vadd.f32 %v908_v56, %v907_v53 }
 0x25a   : > { %v668_v58 = vadd.f32 %v909_v57, %v1539_v28  ;;  %v910_v59 = vpop.f32.mrb[16].mxu1 }
 0x25b   : > { %v911_v60 = vpop.f32.mrb[17].mxu1 }
 0x25c   : > { %718 = vst [vmem:[%s1544_s10 + $0x38] sm:$0xff] %v668_v58  ;;  %v912_v61 = vadd.f32 %v911_v60, %v910_v59 }
 0x25e   : > { %v673_v62 = vadd.f32 %v912_v61, %v1539_v28  ;;  %v913_v63 = vpop.f32.mrb[18].mxu1 }
 0x25f   : > { %v914_v1 = vpop.f32.mrb[19].mxu1 }
 0x260   : > { %719 = vst [vmem:[%s1544_s10 + $0x40] sm:$0xff] %v673_v62  ;;  %v915_v2 = vadd.f32 %v914_v1, %v913_v63 }
 0x262   : > { %v678_v3 = vadd.f32 %v915_v2, %v1539_v28  ;;  %v916_v4 = vpop.f32.mrb[20].mxu1 }
 0x263   : > { %v917_v5 = vpop.f32.mrb[21].mxu1 }
 0x264   : > { %720 = vst [vmem:[%s1544_s10 + $0x48] sm:$0xff] %v678_v3  ;;  %v918_v6 = vadd.f32 %v917_v5, %v916_v4 }
 0x266   : > { %v683_v7 = vadd.f32 %v918_v6, %v1539_v28  ;;  %v919_v8 = vpop.f32.mrb[22].mxu1 }
 0x267   : > { %v920_v9 = vpop.f32.mrb[23].mxu1 }
 0x268   : > { %721 = vst [vmem:[%s1544_s10 + $0x50] sm:$0xff] %v683_v7  ;;  %v921_v10 = vadd.f32 %v920_v9, %v919_v8 }
 0x26a   : > { %v688_v11 = vadd.f32 %v921_v10, %v1539_v28  ;;  %v922_v12 = vpop.f32.mrb[24].mxu1 }
 0x26b   : > { %v923_v13 = vpop.f32.mrb[25].mxu1 }
 0x26c   : > { %722 = vst [vmem:[%s1544_s10 + $0x58] sm:$0xff] %v688_v11  ;;  %v924_v14 = vadd.f32 %v923_v13, %v922_v12 }
 0x26e   : > { %v693_v15 = vadd.f32 %v924_v14, %v1539_v28  ;;  %v925_v16 = vpop.f32.mrb[26].mxu1 }
 0x26f   : > { %v926_v17 = vpop.f32.mrb[27].mxu1 }
 0x270   : > { %723 = vst [vmem:[%s1544_s10 + $0x60] sm:$0xff] %v693_v15  ;;  %v927_v18 = vadd.f32 %v926_v17, %v925_v16 }
 0x272   : > { %v698_v19 = vadd.f32 %v927_v18, %v1539_v28  ;;  %v928_v20 = vpop.f32.mrb[28].mxu1 }
 0x273   : > { %v929_v21 = vpop.f32.mrb[29].mxu1 }
 0x274   : > { %724 = vst [vmem:[%s1544_s10 + $0x68] sm:$0xff] %v698_v19  ;;  %v930_v22 = vadd.f32 %v929_v21, %v928_v20 }
 0x276   : > { %v703_v23 = vadd.f32 %v930_v22, %v1539_v28  ;;  %v931_v24 = vpop.f32.mrb[30].mxu1 }
 0x277   : > { %v932_v25 = vpop.f32.mrb[31].mxu1 }
 0x278   : > { %725 = vst [vmem:[%s1544_s10 + $0x70] sm:$0xff] %v703_v23  ;;  %v933_v26 = vadd.f32 %v932_v25, %v931_v24 }
 0x27a   : > { %v708_v27 = vadd.f32 %v933_v26, %v1539_v28 }
 0x27c   : > { %726 = vst [vmem:[%s1544_s10 + $0x78] sm:$0xff] %v708_v27 }
 0x27d   : > { %1171 = shalt.err (!%p1168_p2)
}
 0x27e   : > { %s1172_s14 = scalar_lea.hbm %s1580_s11, 2048  ;;  %s1176_s12 = scalar_lea.hbm %s1633_s5, 4096 }
 0x27f   : > { %p1173_p13 = scmp.ne.s32.totalorder %s1580_s11, %s1172_s14  ;;  %p1177_p4 = scmp.lt.u32.totalorder %s1580_s11, %s1633_s5 }
 0x280   : > { %p1178_p7 = scmp.lt.u32.totalorder %s1176_s12, %s1172_s14  ;;  %p1180_p11 = scmp.lt.u32.totalorder %s1172_s14, %s1580_s11 }
 0x281   : > { %p1174_p6 = pnand %p1173_p13, %p1647_p0 }
 0x282   : > { %p1179_p8 = por %p1178_p7, %p1177_p4 }
 0x283   : > { %p1175_p10 = pneg %p1174_p6 }
 0x284   : > { %p1181_p1 = por %p1180_p11, %p1179_p8 }
 0x286   : > { %p1182_p3 = pnand %p1181_p1, %p1175_p10 }
 0x288   : > { %1185 = shalt.err (!%p1182_p3)
}
 0x289   : > { %s1239_s28 = smov 128   ;;  %s1240_s9 = smov 8  }
 0x28a   : > { %1008 = dma.vmem_to_hbm [thread:$0]  (%p1647_p0), %s1582_s15, 2048, %s1580_s11, %s728_s23, %s1239_s28, %s1239_s28, %s1240_s9  }
 0x28b PF: > { %s756_s30 = sand.u32 1, %s1216_s18   ;;  %p1648_p5 = scmp.ne.s32.totalorder %s1638_s25, 0 }
 0x28c   : > { %p1649_p9 = scmp.ge.s32.totalorder %s1228_s21, 2  ;;  %s757_s7 = scalar_lea.sflag [#allocation4], %s756_s30 }
 0x28e   : > { %p1022_p12 = pnand %p1649_p9, %p1648_p5 }
 0x290   : > { %1211 = dma.done.wait (!%p1022_p12), %s757_s7, 2048  }
 0x291   : > { %1213 = vsyncadd (!%p1022_p12), %s757_s7, 4294965248  ;;  %p19_p2 = scmp.ge.s32.totalorder %s1384_s16, 4   ;;  %s1650_s18 = smov %s1220_s19 }
 0x292   : > { %s1651_s19 = smov %s1224_s20  ;;  %s1652_s20 = smov %s1393_s27 }
 0x293   : > { %s1653_s21 = smov %s1384_s16  ;;  %21 = sbr.rel (!%p19_p2) target bundleno = 6 (0x6), region = 93 }
 0x29a   :  { %762 = vsyncpa [#allocation3], 1 }
 0x29b   :  { %764 = vsyncpa [#allocation3 + $0x1], 1 }
 0x29c   :  { %765 = vsyncpa [#allocation6], 1 }
 0x29d   :  { %766 = vsyncpa [#allocation4], 1 }
 0x29e   :  { %768 = vsyncpa [#allocation4 + $0x1], 1 }

</bundles_post_ra>
